<compile_context>
chip_gen: v5e
topology: v5e:2x2
jax: 0.10.0
libtpu: 0.0.40
codegen_flags: <defaults>
</compile_context>

<pallas_src>
import math
import functools

import jax
import jax.numpy as jnp
from jax.experimental import pallas as pl
from jax.experimental.pallas import tpu as pltpu


def _layer_norm(y, gamma, beta, eps=1e-5):
    mean = jnp.mean(y, axis=-1, keepdims=True)
    var = jnp.mean((y - mean) ** 2, axis=-1, keepdims=True)
    return (y - mean) * jax.lax.rsqrt(var + eps) * gamma + beta


def decoder_layer_kernel(
    x_ref,                               # (Bb, S, D)   f32
    wqkv_ref, bqkv_ref,                  # (3H, D, Dm) bf16, (3H, 1, Dm) f32
    wo_ref, bo_ref,                      # (H, Dm, D)  bf16, (1, D) f32
    g1_ref, be1_ref,                     # (1, D) f32
    w1_ref, bf1_ref,                     # (D, Dff) bf16, (1, Dff) f32
    w2_ref, bf2_ref,                     # (Dff, D) bf16, (1, D) f32
    g3_ref, be3_ref,                     # (1, D) f32
    o_ref,                               # (Bb, S, D)
    *, num_heads, head_dim,
):
    Bb, S, D = x_ref.shape
    M = Bb * S
    H = num_heads

    x = x_ref[...]                       # (Bb, S, D) f32
    # Fold batch into the row (sublane) dimension: every projection / FFN
    # matmul sees M = Bb*S rows.  Splitting/merging leading dims is layout-free.
    x2d = x.reshape(M, D)
    x_bf = x2d.astype(jnp.bfloat16)

    scale = 1.0 / math.sqrt(head_dim)

    # Accumulate heads straight into the output projection: no concat and no
    # lane-offset slicing (per-head weights are indexed on their leading axis,
    # which is free for static indices).
    attn = jnp.zeros((M, D), jnp.float32)
    for h in range(H):                   # static unroll, num_heads is small
        qh = jnp.dot(x_bf, wqkv_ref[h],
                     preferred_element_type=jnp.float32) + bqkv_ref[h]
        kh = jnp.dot(x_bf, wqkv_ref[H + h],
                     preferred_element_type=jnp.float32) + bqkv_ref[H + h]
        vh = jnp.dot(x_bf, wqkv_ref[2 * H + h],
                     preferred_element_type=jnp.float32) + bqkv_ref[2 * H + h]

        # Per-batch attention (scores must not mix batch elements).
        qh = qh.reshape(Bb, S, head_dim).astype(jnp.bfloat16)
        kh = kh.reshape(Bb, S, head_dim).astype(jnp.bfloat16)
        vh = vh.reshape(Bb, S, head_dim).astype(jnp.bfloat16)

        # NOTE: for non-toy S this (S,S) score matrix should be tiled
        # flash-style over a kv grid axis; at S=8 it is a single vreg.
        s = jnp.einsum("bqd,bkd->bqk", qh, kh,
                       preferred_element_type=jnp.float32) * scale
        s = s - jnp.max(s, axis=-1, keepdims=True)
        p = jnp.exp(s)
        p = p * pl.reciprocal(jnp.sum(p, axis=-1, keepdims=True), approx=True)

        oh = jnp.einsum("bqk,bkd->bqd", p.astype(jnp.bfloat16), vh,
                        preferred_element_type=jnp.float32)
        oh2d = oh.reshape(M, head_dim).astype(jnp.bfloat16)
        attn = attn + jnp.dot(oh2d, wo_ref[h],
                              preferred_element_type=jnp.float32)
    attn = attn + bo_ref[...]

    # Residual + LayerNorm in f32 (dropout == identity in eval mode).
    x1 = _layer_norm(x2d + attn, g1_ref[...], be1_ref[...])

    # Feed-forward: bf16 MXU operands, f32 accumulate, f32 epilogue.
    h1 = jnp.dot(x1.astype(jnp.bfloat16), w1_ref[...],
                 preferred_element_type=jnp.float32) + bf1_ref[...]
    h1 = jnp.maximum(h1, 0.0)
    ff = jnp.dot(h1.astype(jnp.bfloat16), w2_ref[...],
                 preferred_element_type=jnp.float32) + bf2_ref[...]

    out = _layer_norm(x1 + ff, g3_ref[...], be3_ref[...])
    o_ref[...] = out.reshape(Bb, S, D).astype(o_ref.dtype)


def decoder_layer(x, params, *, num_heads, head_dim, batch_block=None):
    B, S, D = x.shape
    if batch_block is None:
        batch_block = B          # fold the whole batch into one grid step
        # (on v7x set batch_block = B // 2 so the parallel batch axis shards
        #  the two TensorCores per chip)
    assert B % batch_block == 0
    nb = B // batch_block

    bf16, f32 = jnp.bfloat16, jnp.float32

    # Stack Q/K/V per-head weights & biases on one leading axis (fewer inputs,
    # fewer DMA descriptors, identical zero-cost static indexing in-kernel).
    wqkv = jnp.concatenate(
        [params["wq"], params["wk"], params["wv"]], axis=0).astype(bf16)   # (3H, D, Dm)
    bqkv = jnp.concatenate(
        [params["bq"], params["bk"], params["bv"]], axis=0).astype(f32)    # (3H, 1, Dm)

    weights = [
        wqkv, bqkv,
        params["wo"].astype(bf16), params["bo"].astype(f32),
        params["g1"].astype(f32),  params["be1"].astype(f32),
        params["w1"].astype(bf16), params["bf1"].astype(f32),
        params["w2"].astype(bf16), params["bf2"].astype(f32),
        params["g3"].astype(f32),  params["be3"].astype(f32),
    ]

    def w_spec(a):
        nd = a.ndim
        return pl.BlockSpec(a.shape, lambda b, nd=nd: (0,) * nd)   # replicated weights

    H, Dm = num_heads, head_dim
    Dff = params["w1"].shape[-1]
    flops = 2 * B * S * (3 * H * D * Dm + 2 * H * S * Dm + H * Dm * D + 2 * D * Dff)
    transcendentals = B * H * S * S + 4 * B * S
    bytes_accessed = (
        x.size * x.dtype.itemsize                       # activations in
        + sum(int(w.size) * w.dtype.itemsize for w in weights)
        + x.size * x.dtype.itemsize                     # output
    )
    cost = pl.CostEstimate(flops=flops, transcendentals=transcendentals,
                           bytes_accessed=bytes_accessed)

    kernel = functools.partial(
        decoder_layer_kernel, num_heads=num_heads, head_dim=head_dim
    )
    return pl.pallas_call(
        kernel,
        out_shape=jax.ShapeDtypeStruct((B, S, D), x.dtype),
        grid_spec=pltpu.PrefetchScalarGridSpec(
            num_scalar_prefetch=0,
            grid=(nb,),
            in_specs=[pl.BlockSpec((batch_block, S, D), lambda b: (b, 0, 0))]
            + [w_spec(a) for a in weights],
            out_specs=pl.BlockSpec((batch_block, S, D), lambda b: (b, 0, 0)),
        ),
        compiler_params=pltpu.CompilerParams(
            dimension_semantics=("parallel",),
        ),
        cost_estimate=cost,
    )(x, *weights)


def reference(x, params, *, num_heads, head_dim):
    """Pure-JAX f32 reference matching the PyTorch forward (eval, mask=None)."""
    outs = []
    for h in range(num_heads):
        q = x @ params["wq"][h] + params["bq"][h]
        k = x @ params["wk"][h] + params["bk"][h]
        v = x @ params["wv"][h] + params["bv"][h]
        s = jnp.einsum("bqd,bkd->bqk", q, k) / math.sqrt(head_dim)
        p = jax.nn.softmax(s, axis=-1)
        outs.append(jnp.einsum("bqk,bkd->bqd", p, v))
    attn = sum(outs[h] @ params["wo"][h] for h in range(num_heads)) + params["bo"]

    def ln(y, g, b, eps=1e-5):
        m = jnp.mean(y, -1, keepdims=True)
        v = jnp.mean((y - m) ** 2, -1, keepdims=True)
        return (y - m) / jnp.sqrt(v + eps) * g + b

    x1 = ln(x + attn, params["g1"], params["be1"])
    ff = jnp.maximum(x1 @ params["w1"] + params["bf1"], 0.0) @ params["w2"] + params["bf2"]
    return ln(x1 + ff, params["g3"], params["be3"])


if __name__ == "__main__":
    # Module hyperparams: d_in == d_model (required for the residual + LayerNorm
    # in the original module to be shape-consistent). Each AttentionHead
    # projects to d_model, so head_dim == d_model.
    B, S = 2, 8
    d_model = 32
    num_heads = 2
    head_dim = d_model
    d_ff = 64

    key = jax.random.PRNGKey(0)
    ks = jax.random.split(key, 16)
    init = lambda k, shape, scale=0.1: (scale * jax.random.normal(k, shape)).astype(jnp.float32)

    params = {
        "wq": init(ks[0], (num_heads, d_model, head_dim)),
        "bq": init(ks[1], (num_heads, 1, head_dim)),
        "wk": init(ks[2], (num_heads, d_model, head_dim)),
        "bk": init(ks[3], (num_heads, 1, head_dim)),
        "wv": init(ks[4], (num_heads, d_model, head_dim)),
        "bv": init(ks[5], (num_heads, 1, head_dim)),
        "wo": init(ks[6], (num_heads, head_dim, d_model)),
        "bo": init(ks[7], (1, d_model)),
        "g1": jnp.ones((1, d_model), jnp.float32),
        "be1": jnp.zeros((1, d_model), jnp.float32),
        "w1": init(ks[8], (d_model, d_ff)),
        "bf1": init(ks[9], (1, d_ff)),
        "w2": init(ks[10], (d_ff, d_model)),
        "bf2": init(ks[11], (1, d_model)),
        "g3": jnp.ones((1, d_model), jnp.float32),
        "be3": jnp.zeros((1, d_model), jnp.float32),
    }

    x = init(ks[12], (B, S, d_model), 1.0)

    out = jax.block_until_ready(
        decoder_layer(x, params, num_heads=num_heads, head_dim=head_dim)
    )
    ref = reference(x, params, num_heads=num_heads, head_dim=head_dim)

    assert out.shape == (B, S, d_model)
    # bf16 matmul operands + approx reciprocal -> loosened tolerance vs f32 ref.
    max_err = float(jnp.max(jnp.abs(out - ref)))
    assert jnp.allclose(out, ref, atol=5e-2, rtol=5e-2), (
        f"mismatch vs reference (max abs err {max_err})"
    )

    # TODO(synk): tgt_mask (masked_fill with -inf) and train-mode dropout are not
    # exercised; kernel implements the default (mask=None, eval) forward path.
    print("KERNEL_OK")
</pallas_src>

<mosaic_0001>
module attributes {stable_mosaic.version = 11 : i64} {
  func.func @decoder_layer_kernel(%arg0: i32, %arg1: memref<2x8x32xf32, #tpu.memory_space<vmem>>, %arg2: memref<6x32x32xbf16, #tpu.memory_space<vmem>>, %arg3: memref<6x1x32xf32, #tpu.memory_space<vmem>>, %arg4: memref<2x32x32xbf16, #tpu.memory_space<vmem>>, %arg5: memref<1x32xf32, #tpu.memory_space<vmem>>, %arg6: memref<1x32xf32, #tpu.memory_space<vmem>>, %arg7: memref<1x32xf32, #tpu.memory_space<vmem>>, %arg8: memref<32x64xbf16, #tpu.memory_space<vmem>>, %arg9: memref<1x64xf32, #tpu.memory_space<vmem>>, %arg10: memref<64x32xbf16, #tpu.memory_space<vmem>>, %arg11: memref<1x32xf32, #tpu.memory_space<vmem>>, %arg12: memref<1x32xf32, #tpu.memory_space<vmem>>, %arg13: memref<1x32xf32, #tpu.memory_space<vmem>>, %arg14: memref<2x8x32xf32, #tpu.memory_space<vmem>>) attributes {dimension_semantics = [#tpu.dimension_semantics<parallel>], iteration_bounds = array<i64: 1>, scalar_prefetch = 0 : i64, scratch_operands = 0 : i64, tpu.core_type = #tpu.core_type<tc>, window_params = [{transform_indices = @transform_0, window_bounds = array<i64: 2, 8, 32>}, {pipeline_mode = #tpu.pipeline_mode<synchronous>, transform_indices = @transform_1, window_bounds = array<i64: 6, 32, 32>}, {pipeline_mode = #tpu.pipeline_mode<synchronous>, transform_indices = @transform_2, window_bounds = array<i64: 6, 1, 32>}, {pipeline_mode = #tpu.pipeline_mode<synchronous>, transform_indices = @transform_3, window_bounds = array<i64: 2, 32, 32>}, {pipeline_mode = #tpu.pipeline_mode<synchronous>, transform_indices = @transform_4, window_bounds = array<i64: 1, 32>}, {pipeline_mode = #tpu.pipeline_mode<synchronous>, transform_indices = @transform_5, window_bounds = array<i64: 1, 32>}, {pipeline_mode = #tpu.pipeline_mode<synchronous>, transform_indices = @transform_6, window_bounds = array<i64: 1, 32>}, {pipeline_mode = #tpu.pipeline_mode<synchronous>, transform_indices = @transform_7, window_bounds = array<i64: 32, 64>}, {pipeline_mode = #tpu.pipeline_mode<synchronous>, transform_indices = @transform_8, window_bounds = array<i64: 1, 64>}, {pipeline_mode = #tpu.pipeline_mode<synchronous>, transform_indices = @transform_9, window_bounds = array<i64: 64, 32>}, {pipeline_mode = #tpu.pipeline_mode<synchronous>, transform_indices = @transform_10, window_bounds = array<i64: 1, 32>}, {pipeline_mode = #tpu.pipeline_mode<synchronous>, transform_indices = @transform_11, window_bounds = array<i64: 1, 32>}, {pipeline_mode = #tpu.pipeline_mode<synchronous>, transform_indices = @transform_12, window_bounds = array<i64: 1, 32>}, {transform_indices = @transform_13, window_bounds = array<i64: 2, 8, 32>}]} {
    %c0 = arith.constant 0 : index
    %c0_0 = arith.constant 0 : index
    %c0_1 = arith.constant 0 : index
    %0 = vector.load %arg1[%c0, %c0_0, %c0_1] : memref<2x8x32xf32, #tpu.memory_space<vmem>>, vector<2x8x32xf32>
    %1 = vector.shape_cast %0 : vector<2x8x32xf32> to vector<16x32xf32>
    %2 = arith.truncf %1 : vector<16x32xf32> to vector<16x32xbf16>
    %cst = arith.constant 0.000000e+00 : f32
    %3 = vector.broadcast %cst : f32 to vector<16x32xf32>
    %c0_2 = arith.constant 0 : index
    %c0_3 = arith.constant 0 : index
    %c0_4 = arith.constant 0 : index
    %4 = vector.load %arg2[%c0_2, %c0_3, %c0_4] : memref<6x32x32xbf16, #tpu.memory_space<vmem>>, vector<1x32x32xbf16>
    %5 = vector.shape_cast %4 : vector<1x32x32xbf16> to vector<32x32xbf16>
    %cst_5 = arith.constant dense<0.000000e+00> : vector<16x32xf32>
    %6 = tpu.matmul %2, %5, %cst_5 {dimension_numbers = #tpu.dot_dimension_numbers<[1], [0], [0], [1], [0, 0, 1, 1], [], []>} : vector<16x32xbf16>, vector<32x32xbf16>, vector<16x32xf32> -> vector<16x32xf32>
    %c0_6 = arith.constant 0 : index
    %c0_7 = arith.constant 0 : index
    %c0_8 = arith.constant 0 : index
    %7 = vector.load %arg3[%c0_6, %c0_7, %c0_8] : memref<6x1x32xf32, #tpu.memory_space<vmem>>, vector<1x1x32xf32>
    %8 = vector.shape_cast %7 : vector<1x1x32xf32> to vector<1x32xf32>
    %9 = vector.broadcast %8 : vector<1x32xf32> to vector<16x32xf32>
    %10 = arith.addf %6, %9 : vector<16x32xf32>
    %c2 = arith.constant 2 : index
    %c0_9 = arith.constant 0 : index
    %c0_10 = arith.constant 0 : index
    %11 = vector.load %arg2[%c2, %c0_9, %c0_10] : memref<6x32x32xbf16, #tpu.memory_space<vmem>>, vector<1x32x32xbf16>
    %12 = vector.shape_cast %11 : vector<1x32x32xbf16> to vector<32x32xbf16>
    %cst_11 = arith.constant dense<0.000000e+00> : vector<16x32xf32>
    %13 = tpu.matmul %2, %12, %cst_11 {dimension_numbers = #tpu.dot_dimension_numbers<[1], [0], [0], [1], [0, 0, 1, 1], [], []>} : vector<16x32xbf16>, vector<32x32xbf16>, vector<16x32xf32> -> vector<16x32xf32>
    %c2_12 = arith.constant 2 : index
    %c0_13 = arith.constant 0 : index
    %c0_14 = arith.constant 0 : index
    %14 = vector.load %arg3[%c2_12, %c0_13, %c0_14] : memref<6x1x32xf32, #tpu.memory_space<vmem>>, vector<1x1x32xf32>
    %15 = vector.shape_cast %14 : vector<1x1x32xf32> to vector<1x32xf32>
    %16 = vector.broadcast %15 : vector<1x32xf32> to vector<16x32xf32>
    %17 = arith.addf %13, %16 : vector<16x32xf32>
    %c4 = arith.constant 4 : index
    %c0_15 = arith.constant 0 : index
    %c0_16 = arith.constant 0 : index
    %18 = vector.load %arg2[%c4, %c0_15, %c0_16] : memref<6x32x32xbf16, #tpu.memory_space<vmem>>, vector<1x32x32xbf16>
    %19 = vector.shape_cast %18 : vector<1x32x32xbf16> to vector<32x32xbf16>
    %cst_17 = arith.constant dense<0.000000e+00> : vector<16x32xf32>
    %20 = tpu.matmul %2, %19, %cst_17 {dimension_numbers = #tpu.dot_dimension_numbers<[1], [0], [0], [1], [0, 0, 1, 1], [], []>} : vector<16x32xbf16>, vector<32x32xbf16>, vector<16x32xf32> -> vector<16x32xf32>
    %c4_18 = arith.constant 4 : index
    %c0_19 = arith.constant 0 : index
    %c0_20 = arith.constant 0 : index
    %21 = vector.load %arg3[%c4_18, %c0_19, %c0_20] : memref<6x1x32xf32, #tpu.memory_space<vmem>>, vector<1x1x32xf32>
    %22 = vector.shape_cast %21 : vector<1x1x32xf32> to vector<1x32xf32>
    %23 = vector.broadcast %22 : vector<1x32xf32> to vector<16x32xf32>
    %24 = arith.addf %20, %23 : vector<16x32xf32>
    %25 = vector.shape_cast %10 : vector<16x32xf32> to vector<2x8x32xf32>
    %26 = arith.truncf %25 : vector<2x8x32xf32> to vector<2x8x32xbf16>
    %27 = vector.shape_cast %17 : vector<16x32xf32> to vector<2x8x32xf32>
    %28 = arith.truncf %27 : vector<2x8x32xf32> to vector<2x8x32xbf16>
    %29 = vector.shape_cast %24 : vector<16x32xf32> to vector<2x8x32xf32>
    %30 = arith.truncf %29 : vector<2x8x32xf32> to vector<2x8x32xbf16>
    "tpu.trace_start"() <{level = 10 : i32, message = "bqd,bkd->bqk"}> : () -> ()
    %cst_21 = arith.constant dense<0.000000e+00> : vector<2x8x8xf32>
    %31 = tpu.matmul %26, %28, %cst_21 {dimension_numbers = #tpu.dot_dimension_numbers<[2], [2], [1], [1], [0, 0, 0, 1, 1, 1], [0], [0]>} : vector<2x8x32xbf16>, vector<2x8x32xbf16>, vector<2x8x8xf32> -> vector<2x8x8xf32>
    "tpu.trace_stop"() : () -> ()
    %cst_22 = arith.constant 0.176776692 : f32
    %32 = vector.broadcast %cst_22 : f32 to vector<2x8x8xf32>
    %33 = arith.mulf %31, %32 : vector<2x8x8xf32>
    %cst_23 = arith.constant dense<0xFF800000> : vector<2x8xf32>
    %34 = vector.multi_reduction <maximumf>, %33, %cst_23 [2] : vector<2x8x8xf32> to vector<2x8xf32>
    %35 = vector.shape_cast %34 : vector<2x8xf32> to vector<2x8x1xf32>
    %36 = vector.broadcast %35 : vector<2x8x1xf32> to vector<2x8x8xf32>
    %37 = arith.subf %33, %36 : vector<2x8x8xf32>
    %38 = math.exp %37 : vector<2x8x8xf32>
    %cst_24 = arith.constant dense<0.000000e+00> : vector<2x8xf32>
    %39 = vector.multi_reduction <add>, %38, %cst_24 [2] : vector<2x8x8xf32> to vector<2x8xf32>
    %40 = vector.shape_cast %39 : vector<2x8xf32> to vector<2x8x1xf32>
    %41 = tpu.reciprocal %40 {approx = true} : vector<2x8x1xf32> -> vector<2x8x1xf32>
    %42 = vector.broadcast %41 : vector<2x8x1xf32> to vector<2x8x8xf32>
    %43 = arith.mulf %38, %42 : vector<2x8x8xf32>
    %44 = arith.truncf %43 : vector<2x8x8xf32> to vector<2x8x8xbf16>
    "tpu.trace_start"() <{level = 10 : i32, message = "bqk,bkd->bqd"}> : () -> ()
    %cst_25 = arith.constant dense<0.000000e+00> : vector<2x8x32xf32>
    %45 = tpu.matmul %44, %30, %cst_25 {dimension_numbers = #tpu.dot_dimension_numbers<[2], [1], [1], [2], [0, 0, 0, 1, 1, 2], [0], [0]>} : vector<2x8x8xbf16>, vector<2x8x32xbf16>, vector<2x8x32xf32> -> vector<2x8x32xf32>
    "tpu.trace_stop"() : () -> ()
    %46 = vector.shape_cast %45 : vector<2x8x32xf32> to vector<16x32xf32>
    %47 = arith.truncf %46 : vector<16x32xf32> to vector<16x32xbf16>
    %c0_26 = arith.constant 0 : index
    %c0_27 = arith.constant 0 : index
    %c0_28 = arith.constant 0 : index
    %48 = vector.load %arg4[%c0_26, %c0_27, %c0_28] : memref<2x32x32xbf16, #tpu.memory_space<vmem>>, vector<1x32x32xbf16>
    %49 = vector.shape_cast %48 : vector<1x32x32xbf16> to vector<32x32xbf16>
    %cst_29 = arith.constant dense<0.000000e+00> : vector<16x32xf32>
    %50 = tpu.matmul %47, %49, %cst_29 {dimension_numbers = #tpu.dot_dimension_numbers<[1], [0], [0], [1], [0, 0, 1, 1], [], []>} : vector<16x32xbf16>, vector<32x32xbf16>, vector<16x32xf32> -> vector<16x32xf32>
    %51 = arith.addf %3, %50 : vector<16x32xf32>
    %c1 = arith.constant 1 : index
    %c0_30 = arith.constant 0 : index
    %c0_31 = arith.constant 0 : index
    %52 = vector.load %arg2[%c1, %c0_30, %c0_31] : memref<6x32x32xbf16, #tpu.memory_space<vmem>>, vector<1x32x32xbf16>
    %53 = vector.shape_cast %52 : vector<1x32x32xbf16> to vector<32x32xbf16>
    %cst_32 = arith.constant dense<0.000000e+00> : vector<16x32xf32>
    %54 = tpu.matmul %2, %53, %cst_32 {dimension_numbers = #tpu.dot_dimension_numbers<[1], [0], [0], [1], [0, 0, 1, 1], [], []>} : vector<16x32xbf16>, vector<32x32xbf16>, vector<16x32xf32> -> vector<16x32xf32>
    %c1_33 = arith.constant 1 : index
    %c0_34 = arith.constant 0 : index
    %c0_35 = arith.constant 0 : index
    %55 = vector.load %arg3[%c1_33, %c0_34, %c0_35] : memref<6x1x32xf32, #tpu.memory_space<vmem>>, vector<1x1x32xf32>
    %56 = vector.shape_cast %55 : vector<1x1x32xf32> to vector<1x32xf32>
    %57 = vector.broadcast %56 : vector<1x32xf32> to vector<16x32xf32>
    %58 = arith.addf %54, %57 : vector<16x32xf32>
    %c3 = arith.constant 3 : index
    %c0_36 = arith.constant 0 : index
    %c0_37 = arith.constant 0 : index
    %59 = vector.load %arg2[%c3, %c0_36, %c0_37] : memref<6x32x32xbf16, #tpu.memory_space<vmem>>, vector<1x32x32xbf16>
    %60 = vector.shape_cast %59 : vector<1x32x32xbf16> to vector<32x32xbf16>
    %cst_38 = arith.constant dense<0.000000e+00> : vector<16x32xf32>
    %61 = tpu.matmul %2, %60, %cst_38 {dimension_numbers = #tpu.dot_dimension_numbers<[1], [0], [0], [1], [0, 0, 1, 1], [], []>} : vector<16x32xbf16>, vector<32x32xbf16>, vector<16x32xf32> -> vector<16x32xf32>
    %c3_39 = arith.constant 3 : index
    %c0_40 = arith.constant 0 : index
    %c0_41 = arith.constant 0 : index
    %62 = vector.load %arg3[%c3_39, %c0_40, %c0_41] : memref<6x1x32xf32, #tpu.memory_space<vmem>>, vector<1x1x32xf32>
    %63 = vector.shape_cast %62 : vector<1x1x32xf32> to vector<1x32xf32>
    %64 = vector.broadcast %63 : vector<1x32xf32> to vector<16x32xf32>
    %65 = arith.addf %61, %64 : vector<16x32xf32>
    %c5 = arith.constant 5 : index
    %c0_42 = arith.constant 0 : index
    %c0_43 = arith.constant 0 : index
    %66 = vector.load %arg2[%c5, %c0_42, %c0_43] : memref<6x32x32xbf16, #tpu.memory_space<vmem>>, vector<1x32x32xbf16>
    %67 = vector.shape_cast %66 : vector<1x32x32xbf16> to vector<32x32xbf16>
    %cst_44 = arith.constant dense<0.000000e+00> : vector<16x32xf32>
    %68 = tpu.matmul %2, %67, %cst_44 {dimension_numbers = #tpu.dot_dimension_numbers<[1], [0], [0], [1], [0, 0, 1, 1], [], []>} : vector<16x32xbf16>, vector<32x32xbf16>, vector<16x32xf32> -> vector<16x32xf32>
    %c5_45 = arith.constant 5 : index
    %c0_46 = arith.constant 0 : index
    %c0_47 = arith.constant 0 : index
    %69 = vector.load %arg3[%c5_45, %c0_46, %c0_47] : memref<6x1x32xf32, #tpu.memory_space<vmem>>, vector<1x1x32xf32>
    %70 = vector.shape_cast %69 : vector<1x1x32xf32> to vector<1x32xf32>
    %71 = vector.broadcast %70 : vector<1x32xf32> to vector<16x32xf32>
    %72 = arith.addf %68, %71 : vector<16x32xf32>
    %73 = vector.shape_cast %58 : vector<16x32xf32> to vector<2x8x32xf32>
    %74 = arith.truncf %73 : vector<2x8x32xf32> to vector<2x8x32xbf16>
    %75 = vector.shape_cast %65 : vector<16x32xf32> to vector<2x8x32xf32>
    %76 = arith.truncf %75 : vector<2x8x32xf32> to vector<2x8x32xbf16>
    %77 = vector.shape_cast %72 : vector<16x32xf32> to vector<2x8x32xf32>
    %78 = arith.truncf %77 : vector<2x8x32xf32> to vector<2x8x32xbf16>
    "tpu.trace_start"() <{level = 10 : i32, message = "bqd,bkd->bqk"}> : () -> ()
    %cst_48 = arith.constant dense<0.000000e+00> : vector<2x8x8xf32>
    %79 = tpu.matmul %74, %76, %cst_48 {dimension_numbers = #tpu.dot_dimension_numbers<[2], [2], [1], [1], [0, 0, 0, 1, 1, 1], [0], [0]>} : vector<2x8x32xbf16>, vector<2x8x32xbf16>, vector<2x8x8xf32> -> vector<2x8x8xf32>
    "tpu.trace_stop"() : () -> ()
    %cst_49 = arith.constant 0.176776692 : f32
    %80 = vector.broadcast %cst_49 : f32 to vector<2x8x8xf32>
    %81 = arith.mulf %79, %80 : vector<2x8x8xf32>
    %cst_50 = arith.constant dense<0xFF800000> : vector<2x8xf32>
    %82 = vector.multi_reduction <maximumf>, %81, %cst_50 [2] : vector<2x8x8xf32> to vector<2x8xf32>
    %83 = vector.shape_cast %82 : vector<2x8xf32> to vector<2x8x1xf32>
    %84 = vector.broadcast %83 : vector<2x8x1xf32> to vector<2x8x8xf32>
    %85 = arith.subf %81, %84 : vector<2x8x8xf32>
    %86 = math.exp %85 : vector<2x8x8xf32>
    %cst_51 = arith.constant dense<0.000000e+00> : vector<2x8xf32>
    %87 = vector.multi_reduction <add>, %86, %cst_51 [2] : vector<2x8x8xf32> to vector<2x8xf32>
    %88 = vector.shape_cast %87 : vector<2x8xf32> to vector<2x8x1xf32>
    %89 = tpu.reciprocal %88 {approx = true} : vector<2x8x1xf32> -> vector<2x8x1xf32>
    %90 = vector.broadcast %89 : vector<2x8x1xf32> to vector<2x8x8xf32>
    %91 = arith.mulf %86, %90 : vector<2x8x8xf32>
    %92 = arith.truncf %91 : vector<2x8x8xf32> to vector<2x8x8xbf16>
    "tpu.trace_start"() <{level = 10 : i32, message = "bqk,bkd->bqd"}> : () -> ()
    %cst_52 = arith.constant dense<0.000000e+00> : vector<2x8x32xf32>
    %93 = tpu.matmul %92, %78, %cst_52 {dimension_numbers = #tpu.dot_dimension_numbers<[2], [1], [1], [2], [0, 0, 0, 1, 1, 2], [0], [0]>} : vector<2x8x8xbf16>, vector<2x8x32xbf16>, vector<2x8x32xf32> -> vector<2x8x32xf32>
    "tpu.trace_stop"() : () -> ()
    %94 = vector.shape_cast %93 : vector<2x8x32xf32> to vector<16x32xf32>
    %95 = arith.truncf %94 : vector<16x32xf32> to vector<16x32xbf16>
    %c1_53 = arith.constant 1 : index
    %c0_54 = arith.constant 0 : index
    %c0_55 = arith.constant 0 : index
    %96 = vector.load %arg4[%c1_53, %c0_54, %c0_55] : memref<2x32x32xbf16, #tpu.memory_space<vmem>>, vector<1x32x32xbf16>
    %97 = vector.shape_cast %96 : vector<1x32x32xbf16> to vector<32x32xbf16>
    %cst_56 = arith.constant dense<0.000000e+00> : vector<16x32xf32>
    %98 = tpu.matmul %95, %97, %cst_56 {dimension_numbers = #tpu.dot_dimension_numbers<[1], [0], [0], [1], [0, 0, 1, 1], [], []>} : vector<16x32xbf16>, vector<32x32xbf16>, vector<16x32xf32> -> vector<16x32xf32>
    %99 = arith.addf %51, %98 : vector<16x32xf32>
    %c0_57 = arith.constant 0 : index
    %c0_58 = arith.constant 0 : index
    %100 = vector.load %arg5[%c0_57, %c0_58] : memref<1x32xf32, #tpu.memory_space<vmem>>, vector<1x32xf32>
    %101 = vector.broadcast %100 : vector<1x32xf32> to vector<16x32xf32>
    %102 = arith.addf %99, %101 : vector<16x32xf32>
    %103 = arith.addf %1, %102 : vector<16x32xf32>
    %c0_59 = arith.constant 0 : index
    %c0_60 = arith.constant 0 : index
    %104 = vector.load %arg6[%c0_59, %c0_60] : memref<1x32xf32, #tpu.memory_space<vmem>>, vector<1x32xf32>
    %c0_61 = arith.constant 0 : index
    %c0_62 = arith.constant 0 : index
    %105 = vector.load %arg7[%c0_61, %c0_62] : memref<1x32xf32, #tpu.memory_space<vmem>>, vector<1x32xf32>
    %cst_63 = arith.constant dense<0.000000e+00> : vector<16xf32>
    %106 = vector.multi_reduction <add>, %103, %cst_63 [1] : vector<16x32xf32> to vector<16xf32>
    %107 = vector.shape_cast %106 : vector<16xf32> to vector<16x1xf32>
    %cst_64 = arith.constant 3.200000e+01 : f32
    %108 = vector.broadcast %cst_64 : f32 to vector<16x1xf32>
    %109 = arith.divf %107, %108 : vector<16x1xf32>
    %110 = vector.broadcast %109 : vector<16x1xf32> to vector<16x32xf32>
    %111 = arith.subf %103, %110 : vector<16x32xf32>
    %112 = arith.mulf %111, %111 : vector<16x32xf32>
    %cst_65 = arith.constant dense<0.000000e+00> : vector<16xf32>
    %113 = vector.multi_reduction <add>, %112, %cst_65 [1] : vector<16x32xf32> to vector<16xf32>
    %114 = vector.shape_cast %113 : vector<16xf32> to vector<16x1xf32>
    %cst_66 = arith.constant 3.200000e+01 : f32
    %115 = vector.broadcast %cst_66 : f32 to vector<16x1xf32>
    %116 = arith.divf %114, %115 : vector<16x1xf32>
    %117 = vector.broadcast %109 : vector<16x1xf32> to vector<16x32xf32>
    %118 = arith.subf %103, %117 : vector<16x32xf32>
    %cst_67 = arith.constant 9.99999974E-6 : f32
    %119 = vector.broadcast %cst_67 : f32 to vector<16x1xf32>
    %120 = arith.addf %116, %119 : vector<16x1xf32>
    %121 = math.rsqrt %120 : vector<16x1xf32>
    %122 = vector.broadcast %121 : vector<16x1xf32> to vector<16x32xf32>
    %123 = arith.mulf %118, %122 : vector<16x32xf32>
    %124 = vector.broadcast %104 : vector<1x32xf32> to vector<16x32xf32>
    %125 = arith.mulf %123, %124 : vector<16x32xf32>
    %126 = vector.broadcast %105 : vector<1x32xf32> to vector<16x32xf32>
    %127 = arith.addf %125, %126 : vector<16x32xf32>
    %128 = arith.truncf %127 : vector<16x32xf32> to vector<16x32xbf16>
    %c0_68 = arith.constant 0 : index
    %c0_69 = arith.constant 0 : index
    %129 = vector.load %arg8[%c0_68, %c0_69] : memref<32x64xbf16, #tpu.memory_space<vmem>>, vector<32x64xbf16>
    %cst_70 = arith.constant dense<0.000000e+00> : vector<16x64xf32>
    %130 = tpu.matmul %128, %129, %cst_70 {dimension_numbers = #tpu.dot_dimension_numbers<[1], [0], [0], [1], [0, 0, 1, 1], [], []>} : vector<16x32xbf16>, vector<32x64xbf16>, vector<16x64xf32> -> vector<16x64xf32>
    %c0_71 = arith.constant 0 : index
    %c0_72 = arith.constant 0 : index
    %131 = vector.load %arg9[%c0_71, %c0_72] : memref<1x64xf32, #tpu.memory_space<vmem>>, vector<1x64xf32>
    %132 = vector.broadcast %131 : vector<1x64xf32> to vector<16x64xf32>
    %133 = arith.addf %130, %132 : vector<16x64xf32>
    %cst_73 = arith.constant 0.000000e+00 : f32
    %134 = vector.broadcast %cst_73 : f32 to vector<16x64xf32>
    %135 = arith.maximumf %133, %134 : vector<16x64xf32>
    %136 = arith.truncf %135 : vector<16x64xf32> to vector<16x64xbf16>
    %c0_74 = arith.constant 0 : index
    %c0_75 = arith.constant 0 : index
    %137 = vector.load %arg10[%c0_74, %c0_75] : memref<64x32xbf16, #tpu.memory_space<vmem>>, vector<64x32xbf16>
    %cst_76 = arith.constant dense<0.000000e+00> : vector<16x32xf32>
    %138 = tpu.matmul %136, %137, %cst_76 {dimension_numbers = #tpu.dot_dimension_numbers<[1], [0], [0], [1], [0, 0, 1, 1], [], []>} : vector<16x64xbf16>, vector<64x32xbf16>, vector<16x32xf32> -> vector<16x32xf32>
    %c0_77 = arith.constant 0 : index
    %c0_78 = arith.constant 0 : index
    %139 = vector.load %arg11[%c0_77, %c0_78] : memref<1x32xf32, #tpu.memory_space<vmem>>, vector<1x32xf32>
    %140 = vector.broadcast %139 : vector<1x32xf32> to vector<16x32xf32>
    %141 = arith.addf %138, %140 : vector<16x32xf32>
    %142 = arith.addf %127, %141 : vector<16x32xf32>
    %c0_79 = arith.constant 0 : index
    %c0_80 = arith.constant 0 : index
    %143 = vector.load %arg12[%c0_79, %c0_80] : memref<1x32xf32, #tpu.memory_space<vmem>>, vector<1x32xf32>
    %c0_81 = arith.constant 0 : index
    %c0_82 = arith.constant 0 : index
    %144 = vector.load %arg13[%c0_81, %c0_82] : memref<1x32xf32, #tpu.memory_space<vmem>>, vector<1x32xf32>
    %cst_83 = arith.constant dense<0.000000e+00> : vector<16xf32>
    %145 = vector.multi_reduction <add>, %142, %cst_83 [1] : vector<16x32xf32> to vector<16xf32>
    %146 = vector.shape_cast %145 : vector<16xf32> to vector<16x1xf32>
    %cst_84 = arith.constant 3.200000e+01 : f32
    %147 = vector.broadcast %cst_84 : f32 to vector<16x1xf32>
    %148 = arith.divf %146, %147 : vector<16x1xf32>
    %149 = vector.broadcast %148 : vector<16x1xf32> to vector<16x32xf32>
    %150 = arith.subf %142, %149 : vector<16x32xf32>
    %151 = arith.mulf %150, %150 : vector<16x32xf32>
    %cst_85 = arith.constant dense<0.000000e+00> : vector<16xf32>
    %152 = vector.multi_reduction <add>, %151, %cst_85 [1] : vector<16x32xf32> to vector<16xf32>
    %153 = vector.shape_cast %152 : vector<16xf32> to vector<16x1xf32>
    %cst_86 = arith.constant 3.200000e+01 : f32
    %154 = vector.broadcast %cst_86 : f32 to vector<16x1xf32>
    %155 = arith.divf %153, %154 : vector<16x1xf32>
    %156 = vector.broadcast %148 : vector<16x1xf32> to vector<16x32xf32>
    %157 = arith.subf %142, %156 : vector<16x32xf32>
    %cst_87 = arith.constant 9.99999974E-6 : f32
    %158 = vector.broadcast %cst_87 : f32 to vector<16x1xf32>
    %159 = arith.addf %155, %158 : vector<16x1xf32>
    %160 = math.rsqrt %159 : vector<16x1xf32>
    %161 = vector.broadcast %160 : vector<16x1xf32> to vector<16x32xf32>
    %162 = arith.mulf %157, %161 : vector<16x32xf32>
    %163 = vector.broadcast %143 : vector<1x32xf32> to vector<16x32xf32>
    %164 = arith.mulf %162, %163 : vector<16x32xf32>
    %165 = vector.broadcast %144 : vector<1x32xf32> to vector<16x32xf32>
    %166 = arith.addf %164, %165 : vector<16x32xf32>
    %167 = vector.shape_cast %166 : vector<16x32xf32> to vector<2x8x32xf32>
    %c0_88 = arith.constant 0 : index
    %c0_89 = arith.constant 0 : index
    %c0_90 = arith.constant 0 : index
    %168 = vector.load %arg14[%c0_88, %c0_89, %c0_90] : memref<2x8x32xf32, #tpu.memory_space<vmem>>, vector<2x8x32xf32>
    tpu.vector_store %arg14[%c0_88, %c0_89, %c0_90], %167 {strides = array<i32>} : memref<2x8x32xf32, #tpu.memory_space<vmem>>, vector<2x8x32xf32>,
    return
  }
  func.func @transform_0(%arg0: i32) -> (i32, i32, i32) {
    %c0_i32 = arith.constant 0 : i32
    %c0_i32_0 = arith.constant 0 : i32
    %c0_i32_1 = arith.constant 0 : i32
    return %arg0, %c0_i32, %c0_i32_0 : i32, i32, i32
  }
  func.func @transform_1(%arg0: i32) -> (i32, i32, i32) {
    %c0_i32 = arith.constant 0 : i32
    %c0_i32_0 = arith.constant 0 : i32
    %c0_i32_1 = arith.constant 0 : i32
    %c0_i32_2 = arith.constant 0 : i32
    return %c0_i32, %c0_i32_0, %c0_i32_1 : i32, i32, i32
  }
  func.func @transform_2(%arg0: i32) -> (i32, i32, i32) {
    %c0_i32 = arith.constant 0 : i32
    %c0_i32_0 = arith.constant 0 : i32
    %c0_i32_1 = arith.constant 0 : i32
    %c0_i32_2 = arith.constant 0 : i32
    return %c0_i32, %c0_i32_0, %c0_i32_1 : i32, i32, i32
  }
  func.func @transform_3(%arg0: i32) -> (i32, i32, i32) {
    %c0_i32 = arith.constant 0 : i32
    %c0_i32_0 = arith.constant 0 : i32
    %c0_i32_1 = arith.constant 0 : i32
    %c0_i32_2 = arith.constant 0 : i32
    return %c0_i32, %c0_i32_0, %c0_i32_1 : i32, i32, i32
  }
  func.func @transform_4(%arg0: i32) -> (i32, i32) {
    %c0_i32 = arith.constant 0 : i32
    %c0_i32_0 = arith.constant 0 : i32
    %c0_i32_1 = arith.constant 0 : i32
    return %c0_i32, %c0_i32_0 : i32, i32
  }
  func.func @transform_5(%arg0: i32) -> (i32, i32) {
    %c0_i32 = arith.constant 0 : i32
    %c0_i32_0 = arith.constant 0 : i32
    %c0_i32_1 = arith.constant 0 : i32
    return %c0_i32, %c0_i32_0 : i32, i32
  }
  func.func @transform_6(%arg0: i32) -> (i32, i32) {
    %c0_i32 = arith.constant 0 : i32
    %c0_i32_0 = arith.constant 0 : i32
    %c0_i32_1 = arith.constant 0 : i32
    return %c0_i32, %c0_i32_0 : i32, i32
  }
  func.func @transform_7(%arg0: i32) -> (i32, i32) {
    %c0_i32 = arith.constant 0 : i32
    %c0_i32_0 = arith.constant 0 : i32
    %c0_i32_1 = arith.constant 0 : i32
    return %c0_i32, %c0_i32_0 : i32, i32
  }
  func.func @transform_8(%arg0: i32) -> (i32, i32) {
    %c0_i32 = arith.constant 0 : i32
    %c0_i32_0 = arith.constant 0 : i32
    %c0_i32_1 = arith.constant 0 : i32
    return %c0_i32, %c0_i32_0 : i32, i32
  }
  func.func @transform_9(%arg0: i32) -> (i32, i32) {
    %c0_i32 = arith.constant 0 : i32
    %c0_i32_0 = arith.constant 0 : i32
    %c0_i32_1 = arith.constant 0 : i32
    return %c0_i32, %c0_i32_0 : i32, i32
  }
  func.func @transform_10(%arg0: i32) -> (i32, i32) {
    %c0_i32 = arith.constant 0 : i32
    %c0_i32_0 = arith.constant 0 : i32
    %c0_i32_1 = arith.constant 0 : i32
    return %c0_i32, %c0_i32_0 : i32, i32
  }
  func.func @transform_11(%arg0: i32) -> (i32, i32) {
    %c0_i32 = arith.constant 0 : i32
    %c0_i32_0 = arith.constant 0 : i32
    %c0_i32_1 = arith.constant 0 : i32
    return %c0_i32, %c0_i32_0 : i32, i32
  }
  func.func @transform_12(%arg0: i32) -> (i32, i32) {
    %c0_i32 = arith.constant 0 : i32
    %c0_i32_0 = arith.constant 0 : i32
    %c0_i32_1 = arith.constant 0 : i32
    return %c0_i32, %c0_i32_0 : i32, i32
  }
  func.func @transform_13(%arg0: i32) -> (i32, i32, i32) {
    %c0_i32 = arith.constant 0 : i32
    %c0_i32_0 = arith.constant 0 : i32
    %c0_i32_1 = arith.constant 0 : i32
    return %arg0, %c0_i32, %c0_i32_0 : i32, i32, i32
  }
}

</mosaic_0001>

<bundles_post_ra>
// kernel: tpu_custom_call.1
= control target key start
LH: loop header
LB: loop body
LE: loop exit
PB: predicated region body
PF: predicated region fallthrough
CT: control target
= control target key end

     0   :  { %18 = vsyncpa [#allocation3], 0  ;;  %s1344_s0 = inlined_call_operand.vmem [shape: f32[2,8,32], index: 0, kind: input, shape index: {}]   ;;  %s1345_s1 = inlined_call_operand.hbm [shape: bf16[6,32,32], index: 1, kind: input, shape index: {}]   ;;  %s1346_s2 = inlined_call_operand.hbm [shape: f32[6,1,32], index: 2, kind: input, shape index: {}]   ;;  %s1347_s3 = inlined_call_operand.vmem [shape: bf16[2,32,32], index: 3, kind: input, shape index: {}]   ;;  %s1348_s4 = inlined_call_operand.vmem [shape: f32[1,32], index: 4, kind: input, shape index: {}]   ;;  %s1349_s5 = inlined_call_operand.vmem [shape: f32[1,32], index: 5, kind: input, shape index: {}]   ;;  %s1350_s6 = inlined_call_operand.vmem [shape: f32[1,32], index: 6, kind: input, shape index: {}]   ;;  %s1351_s7 = inlined_call_operand.hbm [shape: bf16[32,64], index: 7, kind: input, shape index: {}]   ;;  %s1352_s8 = inlined_call_operand.vmem [shape: f32[1,64], index: 8, kind: input, shape index: {}]   ;;  %s1353_s9 = inlined_call_operand.vmem [shape: bf16[64,32], index: 9, kind: input, shape index: {}]   ;;  %s1354_s10 = inlined_call_operand.vmem [shape: f32[1,32], index: 10, kind: input, shape index: {}]   ;;  %s1355_s11 = inlined_call_operand.vmem [shape: f32[1,32], index: 11, kind: input, shape index: {}]   ;;  %s1356_s12 = inlined_call_operand.vmem [shape: f32[1,32], index: 12, kind: input, shape index: {}]   ;;  %s1357_s13 = inlined_call_operand.hbm [shape: f32[2,8,32], index: 13, kind: output, shape index: {}]  }
   0x1   :  { %19 = vsyncpa [#allocation6], 0  ;;  %s40_s27 = sshll.u32 %s1346_s2, 4  ;;  %s41_s27 = int_to_ptr.hbm [resolvable:$true] %s40_s27 }
   0x2   :  { %20 = vsyncpa [#allocation4], 0  ;;  %s1131_s28 = smov [#allocation5]   ;;  %s27_s15 = sshll.u32 %s1345_s1, 4  ;;  %s28_s15 = int_to_ptr.hbm [resolvable:$true] %s27_s15 }
   0x3   :  { %s42_s29 = sshll.u32 %s1131_s28, 4  ;;  %s1132_s16 = smov 16   ;;  %s43_s29 = int_to_ptr.vmem [resolvable:$true] %s42_s29 }
   0x4   :  { %s1133_s17 = smov 1   ;;  %s1134_s18 = smov [#allocation2]  }
   0x5   :  { %48 = dma.hbm_to_vmem [thread:$0]  %s41_s27, 96, %s43_s29, [#allocation6], %s1132_s16, %s1132_s16, %s1133_s17  }
   0x6   :  { %s29_s19 = sshll.u32 %s1134_s18, 4  ;;  %s1135_s20 = smov 64   ;;  %s30_s19 = int_to_ptr.vmem [resolvable:$true] %s29_s19 }
   0x7   :  { %s1136_s21 = smov 4   ;;  %s61_s23 = sshll.u32 %s1351_s7, 4  ;;  %s62_s23 = int_to_ptr.hbm [resolvable:$true] %s61_s23 }
   0x8   :  { %35 = dma.hbm_to_vmem [thread:$0]  %s28_s15, 1536, %s30_s19, [#allocation3], %s1135_s20, %s1135_s20, %s1136_s21  }
   0x9   :  { %s1137_s24 = smov [#allocation7]  }
   0xa   :  { %s63_s25 = sshll.u32 %s1137_s24, 4  ;;  %s64_s25 = int_to_ptr.vmem [resolvable:$true] %s63_s25 }
   0xb   :  { %69 = dma.hbm_to_vmem [thread:$0]  %s62_s23, 256, %s64_s25, [#allocation6], %s1135_s20, %s1135_s20, %s1136_s21  }
   0xc   :  { %1125 = dma.done.wait [#allocation3], 1536  }
   0xd   :  { %1126 = vsyncadd [#allocation3], 4294965760 }
   0xe   :  { %1127 = dma.done.wait [#allocation6], 352  }
   0xf   :  { %1128 = vsyncadd [#allocation6], 4294966944  ;;  %v960_v0 = vld [vmem:[#allocation2 + $0x28] sm:$0xff]  ;;  %v959_v1 = vld [vmem:[#allocation2 + $0x20] sm:$0xff]  ;;  %vm116_vm0 = vcmask 261120   ;;  %vm252_vm1 = vcmask 64512  }
  0x10   :  { %v1224_v2 = vld [vmem:[%s1344_s0] sm:$0xff]  ;;  %v1229_v3 = vld [vmem:[%s1344_s0 + $0x8] sm:$0xff]  ;;  %162 = vmatpush.bf16.msra.mxu1 %v960_v0  ;;  %v968_v33 = vld [vmem:[#allocation2 + $0x38] sm:$0xff]  ;;  %vm280_vm2 = vcmask 1043456   ;;  %vm749_vm10 = vcmask 523264   ;;  %s833_s15 = sshll.u32 %s1357_s13, 4  ;;  %s834_s15 = int_to_ptr.hbm [resolvable:$true] %s833_s15 }
  0x11   :  { %v958_v4 = vld [vmem:[#allocation2 + $0x8] sm:$0xff]  ;;  %v957_v5 = vld [vmem:[#allocation2] sm:$0xff]  ;;  %v1233_v6 = vpack.c.bf16 %v1229_v3, %v1224_v2  ;;  %v966_v34 = vld [vmem:[#allocation2 + $0x18] sm:$0xff]  ;;  %s1141_s16 = smov 8  }
  0x12   :  { %126 = vmatpush.bf16.msra.mxu0 %v958_v4  ;;  %v990_v7 = vld [vmem:[#allocation5 + $0x2] ss:$0 sm:$0xff]  ;;  %v991_v10 = vld [vmem:[#allocation5] ss:$0 sm:$0xff]  ;;  %v962_v23 = vld [vmem:[#allocation2 + $0x48] sm:$0xff] }
  0x13   :  { %198 = vmatpush.bf16.msra.mxu2 %v962_v23  ;;  %v961_v24 = vld [vmem:[#allocation2 + $0x40] sm:$0xff]  ;;  %v967_v35 = vld [vmem:[#allocation2 + $0x30] sm:$0xff] }
  0x14   :  { %163 = vmatpush.bf16.msra.mxu1 %v959_v1  ;;  %v965_v36 = vld [vmem:[#allocation2 + $0x10] sm:$0xff]  ;;  %v992_v37 = vld [vmem:[#allocation5 + $0x4] ss:$0 sm:$0xff]  ;;  %v993_v57 = vld [vmem:[#allocation5 + $0x3] ss:$0 sm:$0xff] }
  0x15   :  { %v994_v4 = vld [vmem:[#allocation5 + $0x1] ss:$0 sm:$0xff] }
  0x16   :  { %127 = vmatpush.bf16.msra.mxu0 %v957_v5 }
  0x17   :  { %864 = vmatmul.msk.bf16.vlgmr.msra.gmra.mxu1 %vm116_vm0, %v1233_v6  ;;  %199 = vmatpush.bf16.msra.mxu2 %v961_v24  ;;  %v970_v24 = vld [vmem:[#allocation2 + $0x58] sm:$0xff] }
  0x19   :  { %855 = vmatmul.msk.bf16.vlgmr.msra.gmra.mxu0 %vm116_vm0, %v1233_v6 }
  0x1a   :  { %873 = vmatmul.msk.bf16.vlgmr.msra.gmra.mxu2 %vm116_vm0, %v1233_v6 }
  0x94   :  { %v165_v8 = vpop.f32.mrf.mxu1 }
  0x95   :  { %v166_v9 = vadd.f32 %v990_v7, %v165_v8 }
  0x96   :  { %v129_v11 = vpop.f32.mrf.mxu0 }
  0x97   :  { %v208_v12 = vpack.c.bf16 %v166_v9, %v166_v9  ;;  %v130_v14 = vadd.f32 %v991_v10, %v129_v11 }
  0x99   :  { %v216_v13 = vsel %vm116_vm0, %v208_v12, 0  ;;  %v206_v16 = vpack.c.bf16 %v130_v14, %v130_v14 }
  0x9a   :  { %225 = vmatpush.bf16.xpose.msra.mxu3 %v216_v13 }
  0x9c   :  { %v167_v15 = vpop.f32.mrf.mxu1 }
  0x9d   :  { %v168_v17 = vadd.f32 %v990_v7, %v167_v15  ;;  %v201_v38 = vpop.f32.mrf.mxu2 }
  0x9e   :  { %v131_v19 = vpop.f32.mrf.mxu0  ;;  %v202_v40 = vadd.f32 %v992_v37, %v201_v38 }
  0x9f   :  { %v209_v18 = vpack.c.bf16 %v168_v17, %v168_v17  ;;  %v132_v21 = vadd.f32 %v991_v10, %v131_v19  ;;  %v964_v19 = vld [vmem:[%s1347_s3 + $0x8] sm:$0xff] }
  0xa0   :  { %v210_v43 = vpack.c.bf16 %v202_v40, %v202_v40 }
  0xa1   :  { %874 = vmatmul.msk.bf16.vlgmr.msra.gmra.mxu3 %vm116_vm0, %v206_v16  ;;  %v235_v20 = vsel %vm116_vm0, %v209_v18, 0  ;;  %v207_v22 = vpack.c.bf16 %v132_v21, %v132_v21 }
  0xa2   :  { %244 = vmatpush.bf16.xpose.msrb.mxu0 %v235_v20  ;;  %349 = vmatpush.bf16.msrb.mxu3 %v966_v34  ;;  %v282_v46 = vsel %vm280_vm2, %v210_v43, 0  ;;  %v963_v20 = vld [vmem:[%s1347_s3] sm:$0xff] }
  0xa3   :  { %291 = vmatpush.bf16.msrb.mxu1 %v282_v46 }
  0xa5   :  { %v203_v48 = vpop.f32.mrf.mxu2 }
  0xa6   :  { %350 = vmatpush.bf16.msrb.mxu3 %v965_v36  ;;  %v204_v49 = vadd.f32 %v992_v37, %v203_v48  ;;  %v995_v36 = vld [vmem:[#allocation5 + $0x5] ss:$0 sm:$0xff] }
  0xa7   :  { %421 = vmatpush.bf16.msra.mxu1 %v970_v24 }
  0xa8   :  { %v211_v50 = vpack.c.bf16 %v204_v49, %v204_v49 }
  0xa9   :  { %875 = vmatmul.msk.bf16.vlgmr.msrb.gmra.mxu0 %vm116_vm0, %v207_v22 }
  0xaa   :  { %385 = vmatpush.bf16.msra.mxu0 %v968_v33  ;;  %v301_v53 = vsel %vm280_vm2, %v211_v50, 0 }
  0xab   :  { %310 = vmatpush.bf16.msrb.mxu2 %v301_v53 }
  0xae   :  { %386 = vmatpush.bf16.msra.mxu0 %v967_v35 }
  0xb1   :  { %886 = vmatmul.msk.bf16.vlgmr.msrb.gmra.mxu3 %vm116_vm0, %v1233_v6 }
  0xb9   :  { %895 = vmatmul.msk.bf16.vlgmr.msra.gmra.mxu0 %vm116_vm0, %v1233_v6 }
 0x124   :  { %v227_v25 = vpop.f32.mrf.mxu3 }
 0x125   :  { %v250_v26 = vmul.f32 0.17677669, %v227_v25  ;;  %v969_v25 = vld [vmem:[#allocation2 + $0x50] sm:$0xff] }
 0x126   :  { %v246_v27 = vpop.f32.mrf.mxu0  ;;  %422 = vmatpush.bf16.msra.mxu1 %v969_v25 }
 0x127   :  { %v251_v28 = vmul.f32 0.17677669, %v246_v27  ;;  %v253_v29 = vsel %vm252_vm1, %v250_v26, -inf }
 0x128   :  { %254 = vmax.xlane.f32.xlu1 %v253_v29 }
 0x129   :  { %v256_v30 = vsel %vm252_vm1, %v251_v28, -inf }
 0x12a   :  { %257 = vmax.xlane.f32.xlu0 %v256_v30 }
 0x12c   :  { %v229_v31 = vpop.f32.mrf.mxu3 }
 0x12e   :  { %v248_v32 = vpop.f32.mrf.mxu0 }
 0x134   :  { %v352_v59 = vpop.f32.mrf.mxu3 }
 0x135   :  { %v353_v17 = vadd.f32 %v994_v4, %v352_v59 }
 0x136   :  { %v388_v56 = vpop.f32.mrf.mxu0 }
 0x137   :  { %v389_v60 = vadd.f32 %v993_v57, %v388_v56  ;;  %v429_v18 = vpack.c.bf16 %v353_v17, %v353_v17 }
 0x139   :  { %v431_v62 = vpack.c.bf16 %v389_v60, %v389_v60 }
 0x13b   :  { %v439_v0 = vsel %vm116_vm0, %v431_v62, 0  ;;  %v972_v62 = vld [vmem:[%s1347_s3 + $0x18] sm:$0xff] }
 0x13c   :  { %448 = vmatpush.bf16.xpose.msra.mxu2 %v439_v0  ;;  %v354_v5 = vpop.f32.mrf.mxu3 }
 0x13d   :  { %v355_v7 = vadd.f32 %v994_v4, %v354_v5 }
 0x13e   :  { %v390_v58 = vpop.f32.mrf.mxu0 }
 0x13f   :  { %v391_v61 = vadd.f32 %v993_v57, %v390_v58  ;;  %v430_v8 = vpack.c.bf16 %v355_v7, %v355_v7 }
 0x141   :  { %v432_v63 = vpack.c.bf16 %v391_v61, %v391_v61 }
 0x143   :  { %v458_v1 = vsel %vm116_vm0, %v432_v63, 0  ;;  %v971_v63 = vld [vmem:[%s1347_s3 + $0x10] sm:$0xff] }
 0x144   :  { %467 = vmatpush.bf16.xpose.msra.mxu3 %v458_v1 }
 0x14b   :  { %906 = vmatmul.msk.bf16.vlgmr.msra.gmra.mxu3 %vm116_vm0, %v430_v8 }
 0x14c   :  { %593 = vmatpush.bf16.msrb.mxu3 %v964_v19 }
 0x150   :  { %594 = vmatpush.bf16.msrb.mxu3 %v963_v20 }
 0x19b   :  { %v255_v39 = vpop.xlane.xlu1 %254 }
 0x19c   :  { %v259_v41 = vsub.f32 %v250_v26, %v255_v39 }
 0x19d   :  { %v258_v42 = vpop.xlane.xlu0 %257 }
 0x19e   :  { %v261_v44 = vmul.f32 1.442695, %v259_v41  ;;  %v260_v45 = vsub.f32 %v251_v28, %v258_v42 }
 0x1a0   :  { %1003 = vpow2.f32 %v261_v44  ;;  %v263_v47 = vmul.f32 1.442695, %v260_v45 }
 0x1a2   :  { %1005 = vpow2.f32 %v263_v47 }
 0x1a6   :  { %v1004_v51 = vpop.eup %1003 }
 0x1a7   :  { %v265_v52 = vsel %vm252_vm1, %v1004_v51, 0.0 }
 0x1a8   :  { %v1006_v54 = vpop.eup %1005  ;;  %266 = vadd.xlane.f32.xlu1 %v265_v52 }
 0x1a9   :  { %v268_v55 = vsel %vm252_vm1, %v1006_v54, 0.0 }
 0x1aa   :  { %269 = vadd.xlane.f32.xlu0 %v268_v55 }
 0x1ce   :  { %v469_v21 = vpop.f32.mrf.mxu3 }
 0x1cf   :  { %v474_v33 = vmul.f32 0.17677669, %v469_v21  ;;  %v1138_v21 = vmov 32.0  }
 0x1d1   :  { %v478_v35 = vsel %vm252_vm1, %v474_v33, -inf }
 0x1d6   :  { %v471_v22 = vpop.f32.mrf.mxu3 }
 0x21b   :  { %v267_v9 = vpop.xlane.xlu1 %266 }
 0x21c   :  { %1007 = vrcp.f32 %v267_v9  ;;  %v996_v9 = vld [vmem:[%s1348_s4] ss:$0 sm:$0xff] }
 0x21d   :  { %v270_v10 = vpop.xlane.xlu0 %269 }
 0x21e   :  { %1009 = vrcp.f32 %v270_v10 }
 0x222   :  { %v1008_v11 = vpop.eup %1007 }
 0x223   :  { %v273_v12 = vmul.f32 %v1008_v11, %v1004_v51 }
 0x224   :  { %v1010_v13 = vpop.eup %1009 }
 0x225   :  { %v274_v14 = vmul.f32 %v1010_v13, %v1006_v54  ;;  %v275_v15 = vpack.c.bf16 %v273_v12, %v273_v12 }
 0x227   :  { %876 = vmatmul.msk.bf16.vlgmr.msrb.gmra.mxu1 %vm252_vm1, %v275_v15  ;;  %v276_v16 = vpack.c.bf16 %v274_v14, %v274_v14 }
 0x229   :  { %877 = vmatmul.msk.bf16.vlgmr.msrb.gmra.mxu2 %vm252_vm1, %v276_v16 }
 0x22a   :  { %564 = vmatpush.bf16.msrb.mxu2 %v972_v62 }
 0x22e   :  { %565 = vmatpush.bf16.msrb.mxu2 %v971_v63 }
 0x237   :  { %904 = vmatmul.msk.bf16.vlgmr.msra.gmra.mxu1 %vm116_vm0, %v1233_v6 }
 0x239   :  { %905 = vmatmul.msk.bf16.vlgmr.msra.gmra.mxu2 %vm116_vm0, %v429_v18 }
 0x2a4   :  { %v293_v23 = vpop.f32.mrf.mxu1 }
 0x2ac   :  { %v295_v26 = vpop.f32.mrf.mxu1  ;;  %v312_v27 = vpop.f32.mrf.mxu2 }
 0x2ad   :  { %v316_v28 = vpack.c.bf16 %v312_v27, %v293_v23 }
 0x2af   :  { %930 = vmatmul.msk.bf16.vlgmr.msrb.gmra.mxu3 %vm116_vm0, %v316_v28 }
 0x2b4   :  { %v314_v29 = vpop.f32.mrf.mxu2  ;;  %v424_v37 = vpop.f32.mrf.mxu1 }
 0x2b5   :  { %v425_v38 = vadd.f32 %v995_v36, %v424_v37 }
 0x2b7   :  { %v433_v39 = vpack.c.bf16 %v425_v38, %v425_v38 }
 0x2b9   :  { %v503_v41 = vsel %vm280_vm2, %v433_v39, 0 }
 0x2ba   :  { %512 = vmatpush.bf16.msrb.mxu0 %v503_v41 }
 0x2bc   :  { %v450_v30 = vpop.f32.mrf.mxu2  ;;  %v426_v43 = vpop.f32.mrf.mxu1 }
 0x2bd   :  { %v473_v31 = vmul.f32 0.17677669, %v450_v30  ;;  %v427_v44 = vadd.f32 %v995_v36, %v426_v43  ;;  %v974_v36 = vld [vmem:[#allocation7 + $0x8] sm:$0xff] }
 0x2be   :  { %702 = vmatpush.bf16.msra.mxu0 %v974_v36 }
 0x2bf   :  { %v475_v32 = vsel %vm252_vm1, %v473_v31, -inf  ;;  %v434_v45 = vpack.c.bf16 %v427_v44, %v427_v44 }
 0x2c0   :  { %476 = vmax.xlane.f32.xlu2 %v475_v32 }
 0x2c1   :  { %v522_v47 = vsel %vm280_vm2, %v434_v45, 0 }
 0x2c2   :  { %531 = vmatpush.bf16.msrb.mxu1 %v522_v47 }
 0x2c4   :  { %v452_v34 = vpop.f32.mrf.mxu2 }
 0x2c8   :  { %479 = vmax.xlane.f32.xlu2 %v478_v35 }
 0x332   :  { %v596_v8 = vpop.f32.mrf.mxu3 }
 0x333   :  { %v477_v40 = vpop.xlane.xlu2 %476 }
 0x334   :  { %v481_v42 = vsub.f32 %v473_v31, %v477_v40  ;;  %v973_v40 = vld [vmem:[#allocation7] sm:$0xff] }
 0x335   :  { %703 = vmatpush.bf16.msra.mxu0 %v973_v40 }
 0x336   :  { %v483_v6 = vmul.f32 1.442695, %v481_v42 }
 0x338   :  { %1011 = vpow2.f32 %v483_v6 }
 0x33a   :  { %v598_v15 = vpop.f32.mrf.mxu3 }
 0x33b   :  { %v480_v46 = vpop.xlane.xlu2 %479 }
 0x33c   :  { %v482_v48 = vsub.f32 %v474_v33, %v480_v46 }
 0x33e   :  { %v1012_v49 = vpop.eup %1011  ;;  %v485_v50 = vmul.f32 1.442695, %v482_v48 }
 0x33f   :  { %v487_v51 = vsel %vm252_vm1, %v1012_v49, 0.0 }
 0x340   :  { %1013 = vpow2.f32 %v485_v50  ;;  %488 = vadd.xlane.f32.xlu0 %v487_v51 }
 0x346   :  { %v1014_v52 = vpop.eup %1013 }
 0x347   :  { %v490_v53 = vsel %vm252_vm1, %v1014_v52, 0.0 }
 0x348   :  { %491 = vadd.xlane.f32.xlu1 %v490_v53 }
 0x3b3   :  { %v489_v54 = vpop.xlane.xlu0 %488 }
 0x3b4   :  { %1015 = vrcp.f32 %v489_v54 }
 0x3ba   :  { %v1016_v55 = vpop.eup %1015 }
 0x3bb   :  { %v495_v56 = vmul.f32 %v1016_v55, %v1012_v49  ;;  %v492_v57 = vpop.xlane.xlu1 %491  ;;  %v997_v55 = vld [vmem:[%s1349_s5] ss:$0 sm:$0xff] }
 0x3bc   :  { %1017 = vrcp.f32 %v492_v57 }
 0x3bd   :  { %v497_v58 = vpack.c.bf16 %v495_v56, %v495_v56  ;;  %1019 = vrcp.f32 %v1138_v21 }
 0x3bf   :  { %907 = vmatmul.msk.bf16.vlgmr.msrb.gmra.mxu0 %vm252_vm1, %v497_v58 }
 0x3c2   :  { %v1018_v59 = vpop.eup %1017 }
 0x3c3   :  { %v496_v60 = vmul.f32 %v1018_v59, %v1014_v52  ;;  %v1020_v22 = vpop.eup %1019  ;;  %v998_v59 = vld [vmem:[%s1350_s6] ss:$0 sm:$0xff] }
 0x3c4   :  { %v618_v23 = vmul.f32 32.0, %v1020_v22  ;;  %vm622_vm3 = vweird.f32 %v1020_v22 }
 0x3c5   :  { %v498_v61 = vpack.c.bf16 %v496_v60, %v496_v60 }
 0x3c6   :  { %v619_v24 = vsub.f32 1.0, %v618_v23 }
 0x3c7   :  { %908 = vmatmul.msk.bf16.vlgmr.msrb.gmra.mxu1 %vm252_vm1, %v498_v61 }
 0x3c8   :  { %v620_v25 = vmul.f32 %v1020_v22, %v619_v24 }
 0x3ca   :  { %v621_v26 = vadd.f32 %v1020_v22, %v620_v25 }
 0x43c   :  { %v514_v0 = vpop.f32.mrf.mxu0 }
 0x444   :  { %v516_v1 = vpop.f32.mrf.mxu0  ;;  %v533_v4 = vpop.f32.mrf.mxu1 }
 0x445   :  { %v537_v5 = vpack.c.bf16 %v533_v4, %v514_v0  ;;  %v978_v4 = vld [vmem:[%s1353_s9 + $0x18] sm:$0xff] }
 0x446   :  { %757 = vmatpush.bf16.msra.mxu1 %v978_v4 }
 0x447   :  { %921 = vmatmul.msk.bf16.vlgmr.msrb.gmra.mxu2 %vm116_vm0, %v537_v5  ;;  %v977_v5 = vld [vmem:[%s1353_s9 + $0x10] sm:$0xff] }
 0x44a   :  { %758 = vmatpush.bf16.msra.mxu1 %v977_v5 }
 0x44c   :  { %v535_v7 = vpop.f32.mrf.mxu1 }
 0x44d   :  { %v976_v7 = vld [vmem:[%s1353_s9 + $0x8] sm:$0xff] }
 0x44e   :  { %759 = vmatpush.bf16.msra.mxu1 %v976_v7 }
 0x4ca   :  { %v567_v10 = vpop.f32.mrf.mxu2 }
 0x4cb   :  { %v597_v11 = vadd.f32 %v596_v8, %v567_v10  ;;  %v975_v8 = vld [vmem:[%s1353_s9] sm:$0xff] }
 0x4cc   :  { %760 = vmatpush.bf16.msra.mxu1 %v975_v8  ;;  %v999_v10 = vld [vmem:[%s1352_s8] ss:$0 sm:$0xff] }
 0x4cd   :  { %v605_v12 = vadd.f32 %v996_v9, %v597_v11 }
 0x4cf   :  { %v607_v13 = vadd.f32 %v605_v12, %v1224_v2  ;;  %v1292_v2 = vsel %vm622_vm3, %v1020_v22, %v621_v26 }
 0x4d1   :  { %v611_v14 = vsel %vm116_vm0, %v607_v13, 0.0 }
 0x4d2   :  { %612 = vadd.xlane.f32.xlu2 %v611_v14  ;;  %v569_v16 = vpop.f32.mrf.mxu2 }
 0x4d3   :  { %v599_v17 = vadd.f32 %v598_v15, %v569_v16 }
 0x4d5   :  { %v606_v18 = vadd.f32 %v996_v9, %v599_v17  ;;  %v1000_v17 = vld [vmem:[%s1354_s10] ss:$0 sm:$0xff] }
 0x4d7   :  { %v608_v19 = vadd.f32 %v606_v18, %v1229_v3 }
 0x4d9   :  { %v614_v20 = vsel %vm116_vm0, %v608_v19, 0.0 }
 0x4da   :  { %615 = vadd.xlane.f32.xlu0 %v614_v20 }
 0x545   :  { %v613_v27 = vpop.xlane.xlu2 %612 }
 0x546   :  { %v624_v28 = vmul.f32 %v1292_v2, %v613_v27 }
 0x548   :  { %v626_v29 = vsub.f32 %v607_v13, %v624_v28 }
 0x54a   :  { %v628_v30 = vmul.f32 %v626_v29, %v626_v29 }
 0x54c   :  { %v630_v3 = vsel %vm116_vm0, %v628_v30, 0.0 }
 0x54d   :  { %631 = vadd.xlane.f32.xlu1 %v630_v3  ;;  %v616_v31 = vpop.xlane.xlu0 %615 }
 0x54e   :  { %v625_v32 = vmul.f32 %v1292_v2, %v616_v31 }
 0x550   :  { %v627_v33 = vsub.f32 %v608_v19, %v625_v32 }
 0x552   :  { %v629_v34 = vmul.f32 %v627_v33, %v627_v33 }
 0x554   :  { %v633_v35 = vsel %vm116_vm0, %v629_v34, 0.0 }
 0x555   :  { %634 = vadd.xlane.f32.xlu2 %v633_v35 }
 0x5c0   :  { %v632_v37 = vpop.xlane.xlu1 %631 }
 0x5c1   :  { %v636_v38 = vmul.f32 %v632_v37, %v1292_v2 }
 0x5c3   :  { %v638_v39 = vadd.f32 1e-05, %v636_v38 }
 0x5c5   :  { %1021 = vrsqrt.f32 %v638_v39  ;;  %vm646_vm5 = vweird.f32 %v638_v39 }
 0x5c8   :  { %v635_v41 = vpop.xlane.xlu2 %634 }
 0x5c9   :  { %v637_v42 = vmul.f32 %v635_v41, %v1292_v2 }
 0x5cb   :  { %v1022_v6 = vpop.eup %1021  ;;  %v639_v43 = vadd.f32 1e-05, %v637_v42 }
 0x5cc   :  { %v641_v44 = vmul.f32 %v1022_v6, %v638_v39  ;;  %vm647_vm4 = vweird.f32 %v1022_v6 }
 0x5cd   :  { %1023 = vrsqrt.f32 %v639_v43  ;;  %vm648_vm6 = vmor %vm646_vm5, %vm647_vm4  ;;  %vm656_vm8 = vweird.f32 %v639_v43 }
 0x5ce   :  { %v642_v45 = vmul.f32 %v1022_v6, %v641_v44 }
 0x5d0   :  { %v643_v46 = vmul.f32 0.5, %v642_v45 }
 0x5d2   :  { %v644_v47 = vsub.f32 1.5, %v643_v46 }
 0x5d3   :  { %v1024_v48 = vpop.eup %1023 }
 0x5d4   :  { %v645_v49 = vmul.f32 %v1022_v6, %v644_v47  ;;  %v651_v50 = vmul.f32 %v1024_v48, %v639_v43  ;;  %vm657_vm7 = vweird.f32 %v1024_v48 }
 0x5d5   :  { %vm658_vm9 = vmor %vm656_vm8, %vm657_vm7 }
 0x5d6   :  { %v652_v51 = vmul.f32 %v1024_v48, %v651_v50  ;;  %v649_v52 = vsel %vm648_vm6, %v1022_v6, %v645_v49 }
 0x5d7   :  { %v660_v56 = vmul.f32 %v649_v52, %v626_v29 }
 0x5d8   :  { %v653_v53 = vmul.f32 0.5, %v652_v51 }
 0x5d9   :  { %v665_v60 = vmul.f32 %v997_v55, %v660_v56 }
 0x5da   :  { %v654_v54 = vsub.f32 1.5, %v653_v53 }
 0x5db   :  { %v670_v63 = vadd.f32 %v998_v59, %v665_v60 }
 0x5dc   :  { %v655_v57 = vmul.f32 %v1024_v48, %v654_v54 }
 0x5de   :  { %v659_v58 = vsel %vm658_vm9, %v1024_v48, %v655_v57  ;;  %v1001_v48 = vld [vmem:[%s1355_s11] ss:$0 sm:$0xff]  ;;  %s1139_s11 = smov [#allocation8]  }
 0x5df   :  { %v661_v61 = vmul.f32 %v659_v58, %v627_v33  ;;  %s831_s29 = sshll.u32 %s1139_s11, 4  ;;  %s832_s29 = int_to_ptr.vmem [resolvable:$true] %s831_s29 }
 0x5e1   :  { %v666_v62 = vmul.f32 %v997_v55, %v661_v61 }
 0x5e3   :  { %v671_v0 = vadd.f32 %v998_v59, %v666_v62 }
 0x5e5   :  { %v672_v1 = vpack.c.bf16 %v671_v0, %v670_v63 }
 0x5e7   :  { %939 = vmatmul.msk.bf16.vlgmr.msra.gmra.mxu0 %vm116_vm0, %v672_v1 }
 0x664   :  { %v705_v9 = vpop.f32.mrf.mxu0 }
 0x665   :  { %v706_v11 = vadd.f32 %v999_v10, %v705_v9 }
 0x667   :  { %v710_v14 = vmax.f32 %v706_v11, 0.0 }
 0x66c   :  { %v707_v12 = vpop.f32.mrf.mxu0 }
 0x66d   :  { %v708_v13 = vadd.f32 %v999_v10, %v707_v12 }
 0x66f   :  { %v711_v15 = vmax.f32 %v708_v13, 0.0 }
 0x671   :  { %v712_v16 = vpack.c.bf16 %v711_v15, %v710_v14 }
 0x673   :  { %956 = vmatmul.msk.bf16.vlgmr.msra.gmra.mxu1 %vm749_vm10, %v712_v16 }
 0x6f0   :  { %v762_v18 = vpop.f32.mrf.mxu1 }
 0x6f1   :  { %v763_v19 = vadd.f32 %v1000_v17, %v762_v18 }
 0x6f3   :  { %v767_v20 = vadd.f32 %v763_v19, %v670_v63 }
 0x6f5   :  { %v771_v21 = vsel %vm116_vm0, %v767_v20, 0.0 }
 0x6f6   :  { %772 = vadd.xlane.f32.xlu0 %v771_v21 }
 0x6f8   :  { %v764_v22 = vpop.f32.mrf.mxu1 }
 0x6f9   :  { %v765_v23 = vadd.f32 %v1000_v17, %v764_v22 }
 0x6fb   :  { %v768_v24 = vadd.f32 %v765_v23, %v671_v0 }
 0x6fd   :  { %v774_v25 = vsel %vm116_vm0, %v768_v24, 0.0 }
 0x6fe   :  { %775 = vadd.xlane.f32.xlu1 %v774_v25 }
 0x769   :  { %v773_v26 = vpop.xlane.xlu0 %772 }
 0x76a   :  { %v777_v27 = vmul.f32 %v773_v26, %v1292_v2 }
 0x76c   :  { %v779_v28 = vsub.f32 %v767_v20, %v777_v27 }
 0x76e   :  { %v781_v29 = vmul.f32 %v779_v28, %v779_v28 }
 0x770   :  { %v783_v30 = vsel %vm116_vm0, %v781_v29, 0.0 }
 0x771   :  { %v776_v3 = vpop.xlane.xlu1 %775  ;;  %784 = vadd.xlane.f32.xlu2 %v783_v30 }
 0x772   :  { %v778_v31 = vmul.f32 %v776_v3, %v1292_v2 }
 0x774   :  { %v780_v32 = vsub.f32 %v768_v24, %v778_v31 }
 0x776   :  { %v782_v33 = vmul.f32 %v780_v32, %v780_v32 }
 0x778   :  { %v786_v34 = vsel %vm116_vm0, %v782_v33, 0.0 }
 0x779   :  { %787 = vadd.xlane.f32.xlu0 %v786_v34 }
 0x7e4   :  { %v785_v35 = vpop.xlane.xlu2 %784 }
 0x7e5   :  { %v789_v36 = vmul.f32 %v785_v35, %v1292_v2 }
 0x7e7   :  { %v791_v37 = vadd.f32 1e-05, %v789_v36 }
 0x7e9   :  { %1025 = vrsqrt.f32 %v791_v37  ;;  %vm799_vm12 = vweird.f32 %v791_v37 }
 0x7ec   :  { %v788_v38 = vpop.xlane.xlu0 %787 }
 0x7ed   :  { %v790_v39 = vmul.f32 %v788_v38, %v1292_v2  ;;  %v1002_v2 = vld [vmem:[%s1356_s12] ss:$0 sm:$0xff]  ;;  %s1140_s12 = smov 128  }
 0x7ef   :  { %v1026_v40 = vpop.eup %1025  ;;  %v792_v41 = vadd.f32 1e-05, %v790_v39 }
 0x7f0   :  { %v794_v42 = vmul.f32 %v1026_v40, %v791_v37  ;;  %vm800_vm11 = vweird.f32 %v1026_v40 }
 0x7f1   :  { %1027 = vrsqrt.f32 %v792_v41  ;;  %vm801_vm13 = vmor %vm799_vm12, %vm800_vm11  ;;  %vm809_vm15 = vweird.f32 %v792_v41 }
 0x7f2   :  { %v795_v6 = vmul.f32 %v1026_v40, %v794_v42 }
 0x7f4   :  { %v796_v43 = vmul.f32 0.5, %v795_v6 }
 0x7f6   :  { %v797_v44 = vsub.f32 1.5, %v796_v43 }
 0x7f7   :  { %v1028_v45 = vpop.eup %1027 }
 0x7f8   :  { %v798_v46 = vmul.f32 %v1026_v40, %v797_v44  ;;  %v804_v47 = vmul.f32 %v1028_v45, %v792_v41  ;;  %vm810_vm14 = vweird.f32 %v1028_v45 }
 0x7f9   :  { %vm811_vm1 = vmor %vm809_vm15, %vm810_vm14 }
 0x7fa   :  { %v802_v49 = vsel %vm801_vm13, %v1026_v40, %v798_v46  ;;  %v805_v50 = vmul.f32 %v1028_v45, %v804_v47 }
 0x7fb   :  { %v813_v51 = vmul.f32 %v802_v49, %v779_v28 }
 0x7fc   :  { %v806_v52 = vmul.f32 0.5, %v805_v50 }
 0x7fd   :  { %v818_v53 = vmul.f32 %v1001_v48, %v813_v51 }
 0x7fe   :  { %v807_v54 = vsub.f32 1.5, %v806_v52 }
 0x7ff   :  { %v823_v55 = vadd.f32 %v1002_v2, %v818_v53 }
 0x800   :  { %v808_v56 = vmul.f32 %v1028_v45, %v807_v54 }
 0x801   :  { %825 = vst.msk [vmem:[#allocation8] sm:$0xff] %vm116_vm0, %v823_v55 }
 0x802   :  { %v812_v57 = vsel %vm811_vm1, %v1028_v45, %v808_v56 }
 0x803   :  { %v814_v58 = vmul.f32 %v812_v57, %v780_v32 }
 0x805   :  { %v819_v59 = vmul.f32 %v1001_v48, %v814_v58 }
 0x807   :  { %v824_v60 = vadd.f32 %v1002_v2, %v819_v59 }
 0x809   :  { %826 = vst.msk [vmem:[#allocation8 + $0x8] sm:$0xff] %vm116_vm0, %v824_v60 }
 0x80a   :  { %839 = dma.vmem_to_hbm [thread:$0]  %s832_s29, 256, %s834_s15, [#allocation4], %s1140_s12, %s1140_s12, %s1141_s16  }
 0x80b   :  { %1129 = dma.done.wait [#allocation4], 256  }
 0x80c   :  { %1130 = vsyncadd [#allocation4], 4294967040 }
 0x80d   :  { %844 = vsyncpa [#allocation3], 1 }
 0x80e   :  { %845 = vsyncpa [#allocation6], 1 }
 0x80f   :  { %846 = vsyncpa [#allocation4], 1 }

</bundles_post_ra>
